<compile_context>
chip_gen: v5e
topology: v5e:2x2
jax: 0.10.0
libtpu: 0.0.40
codegen_flags: <defaults>
</compile_context>

<pallas_src>
from typing import NamedTuple

import numpy as np
import jax
import jax.numpy as jnp
from jax.experimental import pallas as pl
from jax.experimental.pallas import tpu as pltpu


def _round_up(a, b):
    return (a + b - 1) // b * b


def _default_vmem_limit_bytes():
    """Half of physical VMEM, clamped to [32, 64] MiB (safe on v5e/v6e/v7x)."""
    try:
        cap = int(pltpu.get_tpu_info().vmem_capacity_bytes)
    except Exception:  # pragma: no cover - conservative fallback
        cap = 64 * 1024 * 1024
    return max(32 * 1024 * 1024, min(64 * 1024 * 1024, cap // 2))


class LightGCNPrep(NamedTuple):
    """Cached, call-invariant A-side state (compute once, reuse every call)."""
    A_pad: jax.Array        # (n_rows, n_cols) compute_dtype, zero padded
    rows: jax.Array         # (S,) int32: output row-block id per step
    a_rows: jax.Array       # (S,) int32: A row-block id per step (repeats on dummies)
    a_cols: jax.Array       # (S,) int32: A col-block id per step (repeats on dummies)
    valid: jax.Array        # (S,) int32: 1 = real block (do the MXU work)
    init: jax.Array         # (S,) int32: 1 = first step for this output row block
    n: int
    tm: int
    tk: int
    n_rows: int
    n_cols: int
    nI: int
    nK: int
    nnz_blocks: int
    compute_dtype: object


def prepare_lightgcn_adjacency(A, *, tm=512, tk=512, compute_dtype=jnp.bfloat16):
    """One-time A preprocessing: cast -> pad -> block-nnz scan -> schedule."""
    n, n2 = A.shape
    assert n == n2, "A must be n x n"

    # Tile sanitation: bf16 sublane packing (16) for tm, lane (128) for tk.
    tm = min(_round_up(tm, 16), _round_up(n, 16))
    tk = min(_round_up(tk, 128), _round_up(n, 128))
    n_rows = _round_up(n, tm)
    n_cols = _round_up(n, tk)
    nI, nK = n_rows // tm, n_cols // tk

    # Cast BEFORE padding: only one f32 pass over the O(n^2) adjacency.
    A_pad = jnp.pad(A.astype(compute_dtype), ((0, n_rows - n), (0, n_cols - n)))

    # Block-level non-zero mask, computed on the bf16 padded array.
    nz = jnp.any(A_pad.reshape(nI, tm, nK, tk) != 0, axis=(1, 3))
    nz_np = np.asarray(jax.device_get(nz))

    # Flattened schedule over non-zero blocks, grouped by (ascending) row.
    r_nz, c_nz = np.nonzero(nz_np)                      # row-major -> grouped by row
    empty = np.nonzero(~nz_np.any(axis=1))[0]           # row blocks with no work

    rows = np.concatenate([r_nz, empty]).astype(np.int32)
    cols = np.concatenate([c_nz, np.zeros_like(empty)]).astype(np.int32)
    valid = np.concatenate(
        [np.ones_like(r_nz), np.zeros_like(empty)]).astype(np.int32)

    order = np.argsort(rows, kind="stable")
    rows, cols, valid = rows[order], cols[order], valid[order]
    S = int(rows.shape[0])

    init = np.ones(S, np.int32)
    if S > 1:
        init[1:] = (rows[1:] != rows[:-1]).astype(np.int32)

    # For gated-off dummy steps (empty row blocks), point the A/x index maps
    # at the previous step's block so no new tile is DMA'd for unused work.
    idx = np.arange(S)
    last_valid = np.maximum.accumulate(np.where(valid == 1, idx, -1))
    src = np.where(last_valid >= 0, last_valid, idx)
    a_rows = rows[src].astype(np.int32)
    a_cols = cols[src].astype(np.int32)

    return LightGCNPrep(
        A_pad=A_pad,
        rows=jnp.asarray(rows),
        a_rows=jnp.asarray(a_rows),
        a_cols=jnp.asarray(a_cols),
        valid=jnp.asarray(valid),
        init=jnp.asarray(init),
        n=n, tm=tm, tk=tk, n_rows=n_rows, n_cols=n_cols, nI=nI, nK=nK,
        nnz_blocks=int(valid.sum()),
        compute_dtype=compute_dtype,
    )


def _make_lightgcn_kernel(tk, x_resident):
    def kernel(rows_ref, a_rows_ref, a_cols_ref, valid_ref, init_ref,
               a_ref, x_ref, o_ref):
        del rows_ref, a_rows_ref  # only used by the index_maps
        s = pl.program_id(0)

        # First step for this output row block: zero the resident accumulator.
        @pl.when(init_ref[s] == 1)
        def _init():
            o_ref[...] = jnp.zeros_like(o_ref)

        # Real (non-dummy) block: accumulate A_block @ x_block on the MXU.
        @pl.when(valid_ref[s] == 1)
        def _accumulate():
            if x_resident:
                start = pl.multiple_of(a_cols_ref[s] * tk, 128)
                x_tile = x_ref[pl.ds(start, tk), :]
            else:
                x_tile = x_ref[...]
            o_ref[...] += jnp.dot(a_ref[...], x_tile,
                                  preferred_element_type=jnp.float32)

    return kernel


def lightgcn_agg_apply(prep: LightGCNPrep, x, *, vmem_limit_bytes=None,
                       force_x_resident=None):
    """out = A @ x using the cached prep.  Returns float32 [n, d]."""
    n, d = x.shape
    assert n == prep.n, "x row count must match the prepared adjacency"

    d_pad = _round_up(d, 128)                         # lane-dense output
    x_pad = jnp.pad(x.astype(prep.compute_dtype),
                    ((0, prep.n_cols - n), (0, d_pad - d)))

    if vmem_limit_bytes is None:
        vmem_limit_bytes = _default_vmem_limit_bytes()
    vmem_limit_bytes = int(vmem_limit_bytes)

    itemsize = jnp.dtype(prep.compute_dtype).itemsize
    a_tile_bytes = 2 * prep.tm * prep.tk * itemsize          # double-buffered A
    out_tile_bytes = 2 * prep.tm * d_pad * 4                 # f32 accumulator
    x_full_bytes = 2 * prep.n_cols * d_pad * itemsize        # resident x (2 bufs)
    budget = (vmem_limit_bytes * 3) // 4                     # leave headroom
    x_resident = (a_tile_bytes + out_tile_bytes + x_full_bytes) <= budget
    if force_x_resident is not None:
        x_resident = bool(force_x_resident)

    tm, tk = prep.tm, prep.tk
    S = int(prep.rows.shape[0])

    if x_resident:
        # x is DMA'd once (constant index map) and stays resident in VMEM.
        x_spec = pl.BlockSpec((prep.n_cols, d_pad),
                              lambda s, rows, arows, acols, valid, init: (0, 0))
    else:
        # Streamed per block; consecutive equal block ids are not re-fetched.
        x_spec = pl.BlockSpec((tk, d_pad),
                              lambda s, rows, arows, acols, valid, init:
                              (acols[s], 0))

    x_bytes = (prep.n_cols * d_pad * itemsize if x_resident
               else prep.nnz_blocks * tk * d_pad * itemsize)
    cost = pl.CostEstimate(
        flops=2 * prep.nnz_blocks * tm * tk * d_pad,
        transcendentals=0,
        bytes_accessed=(prep.nnz_blocks * tm * tk * itemsize   # A (nnz blocks only)
                        + x_bytes
                        + prep.n_rows * d_pad * 4),            # f32 output
    )

    out_pad = pl.pallas_call(
        _make_lightgcn_kernel(tk, x_resident),
        out_shape=jax.ShapeDtypeStruct((prep.n_rows, d_pad), jnp.float32),
        grid_spec=pltpu.PrefetchScalarGridSpec(
            num_scalar_prefetch=5,                    # rows, a_rows, a_cols, valid, init
            grid=(S,),
            in_specs=[
                # A tile: data-dependent (row, col) block; dummy steps repeat
                # the previous block so they cost no DMA.
                pl.BlockSpec((tm, tk),
                             lambda s, rows, arows, acols, valid, init:
                             (arows[s], acols[s])),
                x_spec,
            ],
            # Output block is constant across each row's run of steps -> it is
            # the resident f32 accumulator; written back on row change.
            out_specs=pl.BlockSpec((tm, d_pad),
                                   lambda s, rows, arows, acols, valid, init:
                                   (rows[s], 0)),
        ),
        compiler_params=pltpu.CompilerParams(
            dimension_semantics=("arbitrary",),
            vmem_limit_bytes=vmem_limit_bytes,
        ),
        cost_estimate=cost,
    )(prep.rows, prep.a_rows, prep.a_cols, prep.valid, prep.init,
      prep.A_pad, x_pad)

    return out_pad[:n, :d]


def lightgcn_agg(A, x, *, tm=512, tk=512, compute_dtype=jnp.bfloat16,
                 **apply_kwargs):
    """One-shot convenience wrapper (prep + apply). Prefer caching the prep."""
    prep = prepare_lightgcn_adjacency(A, tm=tm, tk=tk,
                                      compute_dtype=compute_dtype)
    return lightgcn_agg_apply(prep, x, **apply_kwargs)


if __name__ == "__main__":
    # Small deterministic example consistent with the module:
    #   n = 384 nodes, hidden_size (d) = 128.
    n, hidden_size = 384, 128
    key = jax.random.PRNGKey(0)
    ka, kb, kmask, kx = jax.random.split(key, 4)

    # Block-structured sparse adjacency, materialized densely:
    # ~half of the 128x128 blocks are entirely zero, the rest are ~10% dense.
    bs = 128
    block_keep = jax.random.bernoulli(kb, 0.5, (n // bs, n // bs))
    block_keep = jnp.repeat(jnp.repeat(block_keep, bs, axis=0), bs, axis=1)
    raw = jax.random.uniform(ka, (n, n), dtype=jnp.float32)
    keep = jax.random.uniform(kmask, (n, n)) < 0.1
    A = jnp.where(keep & block_keep, raw, 0.0)
    # Make one whole 128-row block empty to exercise the dummy/zero-row path.
    A = A.at[128:256, :].set(0.0)
    A = A / jnp.maximum(A.sum(axis=1, keepdims=True), 1e-8)  # row-normalized

    x = jax.random.normal(kx, (n, hidden_size), dtype=jnp.float32)

    # Config 1: small explicit tiles + streamed (non-resident) x path.
    # Exercises multi-block accumulation, zero-block skipping and the
    # empty-row dummy step.
    prep1 = prepare_lightgcn_adjacency(A, tm=128, tk=128)
    out1 = jax.block_until_ready(
        lightgcn_agg_apply(prep1, x, force_x_resident=False))
    # Reuse the cached prep for a second call (the intended usage pattern).
    out1b = jax.block_until_ready(lightgcn_agg_apply(prep1, x))

    # Config 2: defaults -> largest clamped tiles, fully VMEM-resident x.
    prep2 = prepare_lightgcn_adjacency(A)
    out2 = jax.block_until_ready(lightgcn_agg_apply(prep2, x))

    # Convenience one-shot wrapper.
    out3 = jax.block_until_ready(lightgcn_agg(A, x))

    # References: same bf16-cast inputs with f32 accumulation (tight check),
    # plus the full-f32 result (loose sanity check on the bf16 tradeoff).
    A16 = A.astype(jnp.bfloat16).astype(jnp.float32)
    x16 = x.astype(jnp.bfloat16).astype(jnp.float32)
    ref16 = A16 @ x16
    ref32 = A @ x
    for out in (out1, out1b, out2, out3):
        assert out.shape == (n, hidden_size)
        assert jnp.allclose(out, ref16, atol=2e-3, rtol=2e-3)
        assert jnp.allclose(out, ref32, atol=3e-2, rtol=3e-2)

    print("KERNEL_OK")
</pallas_src>

<mosaic_0001>
module attributes {stable_mosaic.version = 11 : i64} {
  func.func @kernel(%arg0: i32, %arg1: memref<5xi32, #tpu.memory_space<smem>>, %arg2: memref<5xi32, #tpu.memory_space<smem>>, %arg3: memref<5xi32, #tpu.memory_space<smem>>, %arg4: memref<5xi32, #tpu.memory_space<smem>>, %arg5: memref<5xi32, #tpu.memory_space<smem>>, %arg6: memref<128x128xbf16, #tpu.memory_space<vmem>>, %arg7: memref<128x128xbf16, #tpu.memory_space<vmem>>, %arg8: memref<128x128xf32, #tpu.memory_space<vmem>>) attributes {dimension_semantics = [#tpu.dimension_semantics<arbitrary>], iteration_bounds = array<i64: 5>, scalar_prefetch = 5 : i64, scratch_operands = 0 : i64, tpu.core_type = #tpu.core_type<tc>, window_params = [{transform_indices = @transform_0, window_bounds = array<i64: 128, 128>}, {transform_indices = @transform_1, window_bounds = array<i64: 128, 128>}, {transform_indices = @transform_2, window_bounds = array<i64: 128, 128>}]} {
    %0 = arith.index_cast %arg0 : i32 to index
    %1 = memref.load %arg5[%0] : memref<5xi32, #tpu.memory_space<smem>>
    %c1_i32 = arith.constant 1 : i32
    %2 = arith.cmpi eq, %1, %c1_i32 : i32
    %3 = arith.extui %2 : i1 to i32
    %c0_i32 = arith.constant 0 : i32
    %4 = arith.cmpi ne, %3, %c0_i32 : i32
    scf.if %4 {
      %cst = arith.constant 0.000000e+00 : f32
      %10 = vector.broadcast %cst : f32 to vector<128x128xf32>
      %c0 = arith.constant 0 : index
      %c0_2 = arith.constant 0 : index
      %11 = vector.load %arg8[%c0, %c0_2] : memref<128x128xf32, #tpu.memory_space<vmem>>, vector<128x128xf32>
      tpu.vector_store %arg8[%c0, %c0_2], %10 {strides = array<i32>} : memref<128x128xf32, #tpu.memory_space<vmem>>, vector<128x128xf32>,
    } else {
    }
    %5 = arith.index_cast %arg0 : i32 to index
    %6 = memref.load %arg4[%5] : memref<5xi32, #tpu.memory_space<smem>>
    %c1_i32_0 = arith.constant 1 : i32
    %7 = arith.cmpi eq, %6, %c1_i32_0 : i32
    %8 = arith.extui %7 : i1 to i32
    %c0_i32_1 = arith.constant 0 : i32
    %9 = arith.cmpi ne, %8, %c0_i32_1 : i32
    scf.if %9 {
      %c0 = arith.constant 0 : index
      %c0_2 = arith.constant 0 : index
      %10 = vector.load %arg7[%c0, %c0_2] : memref<128x128xbf16, #tpu.memory_space<vmem>>, vector<128x128xbf16>
      %c0_3 = arith.constant 0 : index
      %c0_4 = arith.constant 0 : index
      %11 = vector.load %arg8[%c0_3, %c0_4] : memref<128x128xf32, #tpu.memory_space<vmem>>, vector<128x128xf32>
      %c0_5 = arith.constant 0 : index
      %c0_6 = arith.constant 0 : index
      %12 = vector.load %arg6[%c0_5, %c0_6] : memref<128x128xbf16, #tpu.memory_space<vmem>>, vector<128x128xbf16>
      %cst = arith.constant dense<0.000000e+00> : vector<128x128xf32>
      %13 = tpu.matmul %12, %10, %cst {dimension_numbers = #tpu.dot_dimension_numbers<[1], [0], [0], [1], [0, 0, 1, 1], [], []>} : vector<128x128xbf16>, vector<128x128xbf16>, vector<128x128xf32> -> vector<128x128xf32>
      %14 = arith.addf %11, %13 : vector<128x128xf32>
      %c0_7 = arith.constant 0 : index
      %c0_8 = arith.constant 0 : index
      %15 = vector.load %arg8[%c0_7, %c0_8] : memref<128x128xf32, #tpu.memory_space<vmem>>, vector<128x128xf32>
      tpu.vector_store %arg8[%c0_7, %c0_8], %14 {strides = array<i32>} : memref<128x128xf32, #tpu.memory_space<vmem>>, vector<128x128xf32>,
    } else {
    }
    return
  }
  func.func @transform_0(%arg0: i32, %arg1: memref<5xi32, #tpu.memory_space<smem>>, %arg2: memref<5xi32, #tpu.memory_space<smem>>, %arg3: memref<5xi32, #tpu.memory_space<smem>>, %arg4: memref<5xi32, #tpu.memory_space<smem>>, %arg5: memref<5xi32, #tpu.memory_space<smem>>) -> (i32, i32) {
    %0 = arith.index_cast %arg0 : i32 to index
    %1 = memref.load %arg2[%0] : memref<5xi32, #tpu.memory_space<smem>>
    %2 = arith.index_cast %arg0 : i32 to index
    %3 = memref.load %arg3[%2] : memref<5xi32, #tpu.memory_space<smem>>
    %c0_i32 = arith.constant 0 : i32
    return %1, %3 : i32, i32
  }
  func.func @transform_1(%arg0: i32, %arg1: memref<5xi32, #tpu.memory_space<smem>>, %arg2: memref<5xi32, #tpu.memory_space<smem>>, %arg3: memref<5xi32, #tpu.memory_space<smem>>, %arg4: memref<5xi32, #tpu.memory_space<smem>>, %arg5: memref<5xi32, #tpu.memory_space<smem>>) -> (i32, i32) {
    %0 = arith.index_cast %arg0 : i32 to index
    %1 = memref.load %arg3[%0] : memref<5xi32, #tpu.memory_space<smem>>
    %c0_i32 = arith.constant 0 : i32
    %c0_i32_0 = arith.constant 0 : i32
    return %1, %c0_i32 : i32, i32
  }
  func.func @transform_2(%arg0: i32, %arg1: memref<5xi32, #tpu.memory_space<smem>>, %arg2: memref<5xi32, #tpu.memory_space<smem>>, %arg3: memref<5xi32, #tpu.memory_space<smem>>, %arg4: memref<5xi32, #tpu.memory_space<smem>>, %arg5: memref<5xi32, #tpu.memory_space<smem>>) -> (i32, i32) {
    %0 = arith.index_cast %arg0 : i32 to index
    %1 = memref.load %arg1[%0] : memref<5xi32, #tpu.memory_space<smem>>
    %c0_i32 = arith.constant 0 : i32
    %c0_i32_0 = arith.constant 0 : i32
    return %1, %c0_i32 : i32, i32
  }
}

</mosaic_0001>

<bundles_post_ra>
// kernel: tpu_custom_call.1
= control target key start
LH: loop header
LB: loop body
LE: loop exit
PB: predicated region body
PF: predicated region fallthrough
CT: control target
= control target key end

     0   :  { %s1121_s30 = smov [#allocation3]   ;;  %s1122_s8 = smov [#allocation4]   ;;  %s1529_s0 = inlined_call_operand.hbm [shape: s32[5], index: 0, kind: input, shape index: {}]   ;;  %s1530_s5 = inlined_call_operand.hbm [shape: bf16[384,384], index: 5, kind: input, shape index: {}]   ;;  %s1531_s6 = inlined_call_operand.hbm [shape: bf16[384,128], index: 6, kind: input, shape index: {}]   ;;  %s1532_s7 = inlined_call_operand.hbm [shape: f32[384,128], index: 7, kind: output, shape index: {}]   ;;  %s1533_s1 = inlined_call_operand.hbm [shape: s32[5], index: 1, kind: input, shape index: {}]   ;;  %s1534_s2 = inlined_call_operand.vmem [shape: s32[5], index: 2, kind: input, shape index: {}]   ;;  %s1535_s3 = inlined_call_operand.vmem [shape: s32[5], index: 3, kind: input, shape index: {}]   ;;  %s1536_s4 = inlined_call_operand.vmem [shape: s32[5], index: 4, kind: input, shape index: {}]  }
   0x1   :  { %1545 = sst [smem:[#allocation31_spill]] %s1530_s5  ;;  %s13_s26 = sshll.u32 %s1529_s0, 4  ;;  %s14_s26 = int_to_ptr.hbm [resolvable:$true] %s13_s26 }
   0x2   :  { %s18_s29 = sshll.u32 %s1533_s1, 4  ;;  %s23_s11 = sshll.u32 %s1534_s2, 4  ;;  %s19_s29 = int_to_ptr.hbm [resolvable:$true] %s18_s29  ;;  %s24_s11 = int_to_ptr.vmem [resolvable:$true] %s23_s11 }
   0x3   :  { %16 = dma.hbm_to_smem %s14_s26, 16, %s1121_s30, [#allocation2] }
   0x4   :  { %21 = dma.hbm_to_smem %s19_s29, 16, %s1122_s8, [#allocation2] }
   0x5   :  { %s28_s14 = sshll.u32 %s1535_s3, 4  ;;  %s1123_s0 = smov [#allocation5]   ;;  %s29_s14 = int_to_ptr.vmem [resolvable:$true] %s28_s14 }
   0x6   :  { %26 = dma.vmem_to_smem %s24_s11, 16, %s1123_s0, [#allocation2] }
   0x7   :  { %s1124_s15 = smov [#allocation6]   ;;  %s33_s17 = sshll.u32 %s1536_s4, 4  ;;  %s34_s17 = int_to_ptr.vmem [resolvable:$true] %s33_s17 }
   0x8   :  { %31 = dma.vmem_to_smem %s29_s14, 16, %s1124_s15, [#allocation2] }
   0x9   :  { %s1125_s18 = smov [#allocation7]  }
   0xa   :  { %36 = dma.vmem_to_smem %s34_s17, 16, %s1125_s18, [#allocation2] }
   0xb   :  { %1067 = dma.done.wait [#allocation2], 80 }
   0xc   :  { %1068 = vsyncadd [#allocation2], 4294967216 }
   0xd   :  { %39 = sfence }
   0xe   :  { %40 = vsyncpa [#allocation9], 0 }
   0xf   :  { %42 = vsyncpa [#allocation9 + $0x1], 0 }
  0x10   :  { %43 = vsyncpa [#allocation12], 0 }
  0x11   :  { %45 = vsyncpa [#allocation12 + $0x1], 0 }
  0x12   :  { %46 = vsyncpa [#allocation10], 0 }
  0x13   :  { %48 = vsyncpa [#allocation10 + $0x1], 0  ;;  %s1187_s2 = smov 0   ;;  %s1189_s3 = smov 0  }
  0x14   :  { %s1191_s19 = smov 0   ;;  %s1193_s20 = smov 0  }
  0x15   :  { %s1195_s4 = smov 0   ;;  %s1197_s21 = smov 0  }
  0x16   :  { %s1199_s22 = smov 0   ;;  %s1201_s23 = smov 0  }
  0x17   :  { %s1203_s24 = smov 0   ;;  %s1205_s25 = smov 0  }
  0x18 LB: > { %1546 = sst [smem:[#allocation25_spill]] %s1103_s21  ;;  %s1238_s26 = sadd.s32 1, %s1119_s25   ;;  %s1119_s25 = sphi %s1205_s25, %s1582_s25   ;;  %s1115_s24 = sphi %s1203_s24, %s1574_s24   ;;  %s1111_s23 = sphi %s1201_s23, %s1581_s23   ;;  %s1107_s22 = sphi %s1199_s22, %s1580_s22   ;;  %s1103_s21 = sphi %s1197_s21, %s1572_s21   ;;  %s1099_s4 = sphi %s1195_s4, %s1579_s4   ;;  %s1095_s20 = sphi %s1193_s20, %s1578_s20   ;;  %s1091_s19 = sphi %s1191_s19, %s1577_s19   ;;  %s1087_s3 = sphi %s1189_s3, %s1576_s3   ;;  %s1083_s2 = sphi %s1187_s2, %s1575_s2  }
  0x19   : > { %1547 = sst [smem:[#allocation26_spill]] %s1115_s24  ;;  %p74_p0 = scmp.ne.s32.totalorder %s1115_s24, %s1111_s23 }
  0x1a   : > { %s58_s27 = sld [smem:[#allocation4 + %s1119_s25]]  ;;  %p75_p1 = scmp.eq.s32.totalorder %s1119_s25, 0 }
  0x1b   : > { %s59_s28 = sld [smem:[#allocation5 + %s1119_s25]]  ;;  %s67_s8 = sadd.s32 1, %s1115_s24 }
  0x1c   : > { %s60_s29 = sld [smem:[#allocation4 + %s1238_s26]]  ;;  %p80_p2 = scmp.ne.s32.totalorder %s1111_s23, %s1107_s22 }
  0x1d   : > { %s61_s30 = sld [smem:[#allocation5 + %s1238_s26]]  ;;  %p1255_p3 = por %p75_p1, %p74_p0 }
  0x1e   : > { %s1251_s9 = sld [smem:[#allocation3 + %s1238_s26]]  ;;  %s160_s11 = sand.u32 1, %s1115_s24  }
  0x1f   : > { %p1539_p4 = scmp.lt.s32.totalorder %s1119_s25, 5  ;;  %s630_s12 = sshll.u32 %s160_s11, 6 }
  0x20   : > { %s164_s15 = scalar_lea.vmem [#allocation8], %s630_s12  ;;  %p637_p7 = scmp.ge.s32.totalorder %s1119_s25, 1 }
  0x21   : > { %s1261_s1 = sshll.u32 %s164_s15, 4  ;;  %p1267_p6 = pnand %p1539_p4, %p1255_p3 }
  0x22   : > { %s62_s13 = ssub.s32 %s58_s27, %s60_s29  ;;  %1549 = sst [smem:[#allocation27_spill]] %s1261_s1 }
  0x23   : > { %s63_s14 = ssub.s32 %s59_s28, %s61_s30  ;;  %p207_p8 = scmp.lt.s32.totalorder %s1119_s25, 6 }
  0x24   : > { %s64_s0 = sor.u32 %s63_s14, %s62_s13  ;;  %s1553_s5 = sld [smem:[#allocation31_spill]] }
  0x25   : > { %p65_p5 = scmp.eq.s32.totalorder %s64_s0, 0  ;;  %p1290_p9 = pnand %p637_p7, %p207_p8 }
  0x26   : > { %s755_s17 = scalar_select %p1255_p3, [#allocation4], [#allocation14] }
  0x27   : > { %s1274_s18 = scalar_select %p65_p5, %s1115_s24, %s67_s8  }
  0x28   : > { %s756_s27 = scalar_select %p1255_p3, %s1119_s25, 0 }
  0x29   : > { %1551 = sst [smem:[#allocation28_spill]] %s1274_s18  ;;  %s1584_s17 = smov (!%p1539_p4, %s755_s17), [#allocation18] }
  0x2a   : > { %s1586_s27 = smov (!%p1539_p4, %s756_s27), 0  ;;  %p943_p11 = pneg %p1267_p6 }
  0x2b   : > { %s757_s28 = scalar_select %p1255_p3, [#allocation5], [#allocation15] }
  0x2c   : > { %s165_s29 = sld [smem:[%s1584_s17 + %s1586_s27]]  ;;  %s161_s17 = scalar_lea.sflag [#allocation9], %s160_s11 }
  0x2d   : > { %s1588_s28 = smov (!%p1539_p4, %s757_s28), [#allocation19] }
  0x2e   : > { %s166_s30 = sld [smem:[%s1588_s28 + %s1586_s27]] }
  0x32   : > { %s754_s12 = smul.u32 48, %s165_s29  ;;  %s946_s29 = scalar_lea.hbm %s1553_s5, 576 }
  0x34   : > { %s171_s13 = sadd.s32 %s754_s12, %s166_s30 }
  0x35   : > { %s633_s14 = sshll.u32 %s171_s13, 2 }
  0x36   : > { %s173_s10 = scalar_lea.hbm %s1553_s5, %s633_s14 }
  0x37   : > { %s174_s18 = sshll.u32 %s173_s10, 4  ;;  %s175_s18 = int_to_ptr.hbm [resolvable:$true] %s174_s18 }
  0x38   : > { %s939_s24 = sshra.s32 %s175_s18, 4  ;;  %s940_s24 = int_to_ptr.hbm [resolvable:$true] %s939_s24 }
  0x39   : > { %s941_s1 = scalar_lea.hbm %s940_s24, 64  ;;  %p947_p0 = scmp.lt.s32.totalorder %s940_s24, %s1553_s5 }
  0x3a   : > { %p942_p10 = scmp.ne.s32.totalorder %s940_s24, %s941_s1  ;;  %p948_p3 = scmp.lt.s32.totalorder %s946_s29, %s941_s1 }
  0x3c   : > { %p944_p12 = pnand %p943_p11, %p942_p10  ;;  %p949_p5 = por %p948_p3, %p947_p0 }
  0x3e   : > { %p945_p13 = pneg %p944_p12 }
  0x40   : > { %p950_p7 = pnand %p949_p5, %p945_p13 }
  0x42   : > { %953 = shalt.err (!%p950_p7)
}
  0x43   : > { %s1126_s11 = smov 192   ;;  %s1554_s13 = sld [smem:[#allocation27_spill]] }
  0x44   : > { %s1542_s24 = smov 64   ;;  %s1543_s1 = smov 4  }
  0x45   : > { %s1312_s0 = sadd.s32 4294967295, %s1119_s25   ;;  %s627_s15 = sadd.s32 4294967294, %s1119_s25  }
  0x46   : > { %p81_p8 = scmp.eq.s32.totalorder %s1312_s0, 0  ;;  %s90_s10 = sld [smem:[#allocation5 + %s1119_s25]] }
  0x47   : > { %s91_s16 = sld [smem:[#allocation5 + %s1238_s26]]  ;;  %s95_s28 = sadd.s32 1, %s1103_s21 }
  0x48   : > { %p1320_p10 = por %p81_p8, %p80_p2  ;;  %p108_p11 = scmp.ne.s32.totalorder %s1099_s4, %s1095_s20 }
  0x49   : > { %s1555_s14 = int_to_ptr.vmem [resolvable:$true] %s1554_s13  ;;  %p102_p12 = scmp.ne.s32.totalorder %s1103_s21, %s1099_s4 }
  0x4a   : > { %776 = dma.hbm_to_vmem [thread:$0]  (!%p1267_p6), %s175_s18, 1024, %s1555_s14, %s161_s17, %s1126_s11, %s1542_s24, %s1543_s1  }
  0x4b   : > { %s1556_s27 = scalar_select %p1320_p10, 1, 0 }
  0x4c   : > { %s118_s18 = sld [smem:[#allocation3 + %s1119_s25]]  ;;  %p1331_p6 = por %p108_p11, %p81_p8 }
  0x4d   : > { %s123_s22 = sadd.s32 1, %s1091_s19  ;;  %p133_p2 = scmp.ne.s32.totalorder %s1091_s19, %s1087_s3 }
  0x4e   : > { %s1557_s17 = scalar_select %p1331_p6, 1, 0 }
  0x4f   : > { %p134_p13 = scmp.eq.s32.totalorder %s1312_s0, 4  ;;  %p139_p0 = scmp.ne.s32.totalorder %s1087_s3, %s1083_s2 }
  0x50   : > { %p140_p3 = scmp.eq.s32.totalorder %s627_s15, 4  ;;  %s92_s29 = ssub.s32 %s90_s10, %s91_s16 }
  0x51   : > { %p1341_p5 = por %p134_p13, %p133_p2  ;;  %p93_p7 = scmp.eq.s32.totalorder %s92_s29, 0 }
  0x52   : > { %p1345_p4 = por %p140_p3, %p139_p0  ;;  %p104_p8 = por %p102_p12, %p75_p1 }
  0x53   : > { %s120_s12 = ssub.s32 %s118_s18, %s1251_s9  ;;  %s186_s13 = sand.u32 1, %s1103_s21  }
  0x54   : > { %s1353_s11 = scalar_select %p93_p7, %s1103_s21, %s95_s28  }
  0x55   : > { %p121_p11 = scmp.eq.s32.totalorder %s120_s12, 0  ;;  %p1561_p6 = scmp.lt.s32.totalorder %s1119_s25, 5 }
  0x56   : > { %1560 = sst [smem:[#allocation29_spill]] %s1353_s11  ;;  %s634_s10 = sshll.u32 %s186_s13, 6 }
  0x57   : > { %p1358_p10 = pnand %p1561_p6, %p104_p8  ;;  %p1564_p2 = pmov %p1561_p6 }
  0x58   : > { %s1363_s15 = scalar_select %p121_p11, %s1091_s19, %s123_s22  }
  0x59   : > { %s760_s16 = scalar_select %p104_p8, [#allocation5], [#allocation16] }
  0x5a   : > { %1563 = sst [smem:[#allocation30_spill]] %s1363_s15  ;;  %p1565_p13 = pmov %p1564_p2 }
  0x5b   : > { %s761_s29 = scalar_select %p104_p8, %s1119_s25, 0 }
  0x5c   : > { %s1590_s16 = smov (!%p1564_p2, %s760_s16), [#allocation20]  ;;  %s190_s28 = scalar_lea.vmem [#allocation11], %s634_s10 }
  0x5d   : > { %s1592_s29 = smov (!%p1565_p13, %s761_s29), 0  ;;  %s199_s18 = sshll.u32 %s190_s28, 4  ;;  %s200_s18 = int_to_ptr.vmem [resolvable:$true] %s199_s18 }
  0x5e   : > { %s191_s9 = sld [smem:[%s1590_s16 + %s1592_s29]]  ;;  %s187_s22 = scalar_lea.sflag [#allocation12], %s186_s13 }
  0x5f   : > { %p973_p12 = pneg %p1358_p10  ;;  %s976_s29 = scalar_lea.hbm %s1531_s6, 192 }
  0x64   : > { %s712_s12 = sshll.u32 %s191_s9, 6 }
  0x65   : > { %s196_s5 = scalar_lea.hbm %s1531_s6, %s712_s12 }
  0x66   : > { %s197_s11 = sshll.u32 %s196_s5, 4  ;;  %s198_s11 = int_to_ptr.hbm [resolvable:$true] %s197_s11 }
  0x67   : > { %s969_s21 = sshra.s32 %s198_s11, 4  ;;  %s970_s21 = int_to_ptr.hbm [resolvable:$true] %s969_s21 }
  0x68   : > { %s971_s15 = scalar_lea.hbm %s970_s21, 64  ;;  %p977_p3 = scmp.lt.s32.totalorder %s970_s21, %s1531_s6 }
  0x69   : > { %p972_p1 = scmp.ne.s32.totalorder %s970_s21, %s971_s15  ;;  %p978_p7 = scmp.lt.s32.totalorder %s976_s29, %s971_s15 }
  0x6b   : > { %p974_p6 = pnand %p973_p12, %p972_p1  ;;  %p979_p8 = por %p978_p7, %p977_p3 }
  0x6d   : > { %p975_p0 = pneg %p974_p6 }
  0x6f   : > { %p980_p11 = pnand %p979_p8, %p975_p0 }
  0x71   : > { %983 = shalt.err (!%p980_p11)
}
  0x72   : > { %s1566_s5 = smov 4   ;;  %s1567_s24 = smov 64  }
  0x73   : > { %781 = dma.hbm_to_vmem [thread:$0]  (!%p1358_p10), %s198_s11, 1024, %s200_s18, %s187_s22, %s1567_s24, %s1567_s24, %s1566_s5  }
  0x74   : > { %211 = sbr.rel (%p1290_p9) target bundleno = 386 (0x182), region = 28  ;;  %s213_s1 = sand.u32 (!%p1290_p9), 1, %s1111_s23  }
  0x75   : > { %s638_s13 = sshll.u32 (!%p1290_p9), %s213_s1, 6  ;;  %s214_s12 = scalar_lea.sflag (!%p1290_p9), [#allocation9], %s213_s1 }
  0x76   : > { %s1389_s16 = scalar_lea.vmem (!%p1290_p9), [#allocation8], %s638_s13  ;;  %p1568_p2 = scmp.ne.s32.totalorder (!%p1290_p9), %s1556_s27, 0 }
  0x79   : > { %1070 = dma.done.wait (%p1568_p2), %s214_s12, 1024  }
  0x7a   : > { %1072 = vsyncadd (%p1568_p2), %s214_s12, 4294966272  ;;  %s223_s21 = sand.u32 1, %s1099_s4   ;;  %p1569_p9 = scmp.ne.s32.totalorder %s1557_s17, 0 }
  0x7b   : > { %s639_s14 = sshll.u32 %s223_s21, 6  ;;  %s224_s11 = scalar_lea.sflag [#allocation12], %s223_s21 }
  0x7c   : > { %s1396_s15 = scalar_lea.vmem [#allocation11], %s639_s14 }
  0x7d   : > { %1074 = dma.done.wait (%p1569_p9), %s224_s11, 1024  }
  0x7e   : > { %1076 = vsyncadd (%p1569_p9), %s224_s11, 4294966272  ;;  %s251_s8 = sand.u32 1, %s1087_s3   ;;  %s261_s18 = sld [smem:[#allocation7 + %s1312_s0]] }
  0x7f   : > { %s640_s27 = sshll.u32 %s251_s8, 7 }
  0x80   : > { %s1406_s22 = scalar_lea.vmem [#allocation13], %s640_s27 }
  0x84   : > { %p641_p10 = scmp.ne.s32.totalorder %s261_s18, 1 }
  0x86   : > { %265 = sbr.rel (%p641_p10) target bundleno = 156 (0x9c), region = 40 }
  0x8b   : > { %v1129_v0 = vmov 0.0  }
  0x8c   : > { %266 = vst [vmem:[%s1406_s22] sm:$0xff] %v1129_v0 }
  0x8d   : > { %267 = vst [vmem:[%s1406_s22 + $0x8] sm:$0xff] %v1129_v0 }
  0x8e   : > { %268 = vst [vmem:[%s1406_s22 + $0x10] sm:$0xff] %v1129_v0 }
  0x8f   : > { %269 = vst [vmem:[%s1406_s22 + $0x18] sm:$0xff] %v1129_v0 }
  0x90   : > { %270 = vst [vmem:[%s1406_s22 + $0x20] sm:$0xff] %v1129_v0 }
  0x91   : > { %271 = vst [vmem:[%s1406_s22 + $0x28] sm:$0xff] %v1129_v0 }
  0x92   : > { %272 = vst [vmem:[%s1406_s22 + $0x30] sm:$0xff] %v1129_v0 }
  0x93   : > { %273 = vst [vmem:[%s1406_s22 + $0x38] sm:$0xff] %v1129_v0 }
  0x94   : > { %274 = vst [vmem:[%s1406_s22 + $0x40] sm:$0xff] %v1129_v0 }
  0x95   : > { %275 = vst [vmem:[%s1406_s22 + $0x48] sm:$0xff] %v1129_v0 }
  0x96   : > { %276 = vst [vmem:[%s1406_s22 + $0x50] sm:$0xff] %v1129_v0 }
  0x97   : > { %277 = vst [vmem:[%s1406_s22 + $0x58] sm:$0xff] %v1129_v0 }
  0x98   : > { %278 = vst [vmem:[%s1406_s22 + $0x60] sm:$0xff] %v1129_v0 }
  0x99   : > { %279 = vst [vmem:[%s1406_s22 + $0x68] sm:$0xff] %v1129_v0 }
  0x9a   : > { %280 = vst [vmem:[%s1406_s22 + $0x70] sm:$0xff] %v1129_v0 }
  0x9b   : > { %281 = vst [vmem:[%s1406_s22 + $0x78] sm:$0xff] %v1129_v0 }
  0x9c PF: > { %s282_s17 = sld [smem:[#allocation6 + %s1312_s0]] }
  0xa2   : > { %p642_p13 = scmp.ne.s32.totalorder %s282_s17, 1 }
  0xa4   : > { %286 = sbr.rel (%p642_p13) target bundleno = 362 (0x16a), region = 44 }
  0xa9   : > { %v720_v1 = vld [vmem:[%s1396_s15 + $0x38] sm:$0xff]  ;;  %v719_v2 = vld [vmem:[%s1396_s15 + $0x30] sm:$0xff]  ;;  %v718_v3 = vld [vmem:[%s1396_s15 + $0x28] sm:$0xff] }
  0xaa   : > { %431 = vmatpush.bf16.msra.mxu0 %v720_v1  ;;  %730 = vmatpush.bf16.msra.mxu1 %v720_v1  ;;  %v717_v4 = vld [vmem:[%s1396_s15 + $0x20] sm:$0xff]  ;;  %v716_v5 = vld [vmem:[%s1396_s15 + $0x18] sm:$0xff]  ;;  %v715_v6 = vld [vmem:[%s1396_s15 + $0x10] sm:$0xff] }
  0xab   : > { %731 = vmatpush.bf16.msra.mxu2 %v720_v1  ;;  %732 = vmatpush.bf16.msra.mxu3 %v720_v1  ;;  %v714_v7 = vld [vmem:[%s1396_s15 + $0x8] sm:$0xff]  ;;  %v713_v8 = vld [vmem:[%s1396_s15] sm:$0xff]  ;;  %v723_v10 = vld [vmem:[%s1389_s16 + $0x10] sm:$0xff] }
  0xac   : > { %v721_v9 = vld [vmem:[%s1389_s16] sm:$0xff]  ;;  %v727_v12 = vld [vmem:[%s1389_s16 + $0x30] sm:$0xff]  ;;  %v722_v13 = vld [vmem:[%s1389_s16 + $0x8] sm:$0xff] }
  0xad   : > { %v725_v11 = vld [vmem:[%s1389_s16 + $0x20] sm:$0xff]  ;;  %v724_v14 = vld [vmem:[%s1389_s16 + $0x18] sm:$0xff]  ;;  %v726_v15 = vld [vmem:[%s1389_s16 + $0x28] sm:$0xff] }
  0xae   : > { %432 = vmatpush.bf16.msra.mxu0 %v719_v2  ;;  %733 = vmatpush.bf16.msra.mxu1 %v719_v2  ;;  %v728_v16 = vld [vmem:[%s1389_s16 + $0x38] sm:$0xff]  ;;  %v303_v17 = vld [vmem:[%s1406_s22] sm:$0xff]  ;;  %v304_v25 = vld [vmem:[%s1406_s22 + $0x8] sm:$0xff] }
  0xaf   : > { %734 = vmatpush.bf16.msra.mxu2 %v719_v2  ;;  %735 = vmatpush.bf16.msra.mxu3 %v719_v2  ;;  %v307_v18 = vld [vmem:[%s1406_s22 + $0x20] sm:$0xff]  ;;  %v308_v26 = vld [vmem:[%s1406_s22 + $0x28] sm:$0xff]  ;;  %v305_v37 = vld [vmem:[%s1406_s22 + $0x10] sm:$0xff] }
  0xb0   : > { %v311_v23 = vld [vmem:[%s1406_s22 + $0x40] sm:$0xff]  ;;  %v312_v35 = vld [vmem:[%s1406_s22 + $0x48] sm:$0xff]  ;;  %v309_v38 = vld [vmem:[%s1406_s22 + $0x30] sm:$0xff] }
  0xb1   : > { %v315_v24 = vld [vmem:[%s1406_s22 + $0x60] sm:$0xff]  ;;  %v316_v36 = vld [vmem:[%s1406_s22 + $0x68] sm:$0xff]  ;;  %v313_v47 = vld [vmem:[%s1406_s22 + $0x50] sm:$0xff] }
  0xb2   : > { %433 = vmatpush.bf16.msra.mxu0 %v718_v3  ;;  %736 = vmatpush.bf16.msra.mxu1 %v718_v3  ;;  %v317_v48 = vld [vmem:[%s1406_s22 + $0x70] sm:$0xff]  ;;  %v306_v49 = vld [vmem:[%s1406_s22 + $0x18] sm:$0xff] }
  0xb3   : > { %737 = vmatpush.bf16.msra.mxu2 %v718_v3  ;;  %738 = vmatpush.bf16.msra.mxu3 %v718_v3  ;;  %v310_v50 = vld [vmem:[%s1406_s22 + $0x38] sm:$0xff] }
  0xb4   : > { %v314_v59 = vld [vmem:[%s1406_s22 + $0x58] sm:$0xff] }
  0xb5   : > { %v318_v60 = vld [vmem:[%s1406_s22 + $0x78] sm:$0xff] }
  0xb6   : > { %434 = vmatpush.bf16.msra.mxu0 %v717_v4  ;;  %739 = vmatpush.bf16.msra.mxu1 %v717_v4 }
  0xb7   : > { %740 = vmatpush.bf16.msra.mxu2 %v717_v4  ;;  %741 = vmatpush.bf16.msra.mxu3 %v717_v4 }
  0xba   : > { %435 = vmatpush.bf16.msra.mxu0 %v716_v5  ;;  %742 = vmatpush.bf16.msra.mxu1 %v716_v5 }
  0xbb   : > { %743 = vmatpush.bf16.msra.mxu2 %v716_v5  ;;  %744 = vmatpush.bf16.msra.mxu3 %v716_v5 }
  0xbe   : > { %436 = vmatpush.bf16.msra.mxu0 %v715_v6  ;;  %745 = vmatpush.bf16.msra.mxu1 %v715_v6 }
  0xbf   : > { %746 = vmatpush.bf16.msra.mxu2 %v715_v6  ;;  %747 = vmatpush.bf16.msra.mxu3 %v715_v6 }
  0xc2   : > { %437 = vmatpush.bf16.msra.mxu0 %v714_v7  ;;  %748 = vmatpush.bf16.msra.mxu1 %v714_v7 }
  0xc3   : > { %749 = vmatpush.bf16.msra.mxu2 %v714_v7  ;;  %750 = vmatpush.bf16.msra.mxu3 %v714_v7 }
  0xc6   : > { %438 = vmatpush.bf16.msra.mxu0 %v713_v8  ;;  %751 = vmatpush.bf16.msra.mxu1 %v713_v8 }
  0xc7   : > { %752 = vmatpush.bf16.msra.mxu2 %v713_v8  ;;  %753 = vmatpush.bf16.msra.mxu3 %v713_v8 }
  0xc9   : > { %439 = vmatmul.bf16.vlgmr.msra.gmra.mxu0 %v721_v9  ;;  %449 = vmatmul.bf16.vlgmr.msra.gmra.mxu1 %v723_v10 }
  0xca   : > { %459 = vmatmul.bf16.vlgmr.msra.gmra.mxu2 %v725_v11  ;;  %469 = vmatmul.bf16.vlgmr.msra.gmra.mxu3 %v727_v12 }
  0xd9   : > { %444 = vmatmul.bf16.gmra.mxu0 %v722_v13  ;;  %454 = vmatmul.bf16.gmra.mxu1 %v724_v14 }
  0xda   : > { %464 = vmatmul.bf16.gmra.mxu2 %v726_v15  ;;  %474 = vmatmul.bf16.gmra.mxu3 %v728_v16 }
 0x146   : > { %v440_v19 = vpop.f32.mrf.mxu0  ;;  %v450_v20 = vpop.f32.mrf.mxu1 }
 0x147   : > { %v480_v21 = vadd.f32 %v440_v19, %v303_v17  ;;  %v484_v22 = vadd.f32 %v450_v20, %v307_v18 }
 0x149   : > { %496 = vst [vmem:[%s1406_s22] sm:$0xff] %v480_v21 }
 0x14a   : > { %500 = vst [vmem:[%s1406_s22 + $0x20] sm:$0xff] %v484_v22 }
 0x14d   : > { %v460_v27 = vpop.f32.mrf.mxu2  ;;  %v470_v28 = vpop.f32.mrf.mxu3 }
 0x14e   : > { %v488_v29 = vadd.f32 %v460_v27, %v311_v23  ;;  %v492_v30 = vadd.f32 %v470_v28, %v315_v24  ;;  %v442_v31 = vpop.f32.mrf.mxu0  ;;  %v452_v32 = vpop.f32.mrf.mxu1 }
 0x14f   : > { %v481_v33 = vadd.f32 %v442_v31, %v304_v25  ;;  %v485_v34 = vadd.f32 %v452_v32, %v308_v26 }
 0x150   : > { %504 = vst [vmem:[%s1406_s22 + $0x40] sm:$0xff] %v488_v29 }
 0x151   : > { %508 = vst [vmem:[%s1406_s22 + $0x60] sm:$0xff] %v492_v30 }
 0x152   : > { %497 = vst [vmem:[%s1406_s22 + $0x8] sm:$0xff] %v481_v33 }
 0x153   : > { %501 = vst [vmem:[%s1406_s22 + $0x28] sm:$0xff] %v485_v34 }
 0x155   : > { %v462_v39 = vpop.f32.mrf.mxu2  ;;  %v472_v40 = vpop.f32.mrf.mxu3 }
 0x156   : > { %v489_v41 = vadd.f32 %v462_v39, %v312_v35  ;;  %v493_v42 = vadd.f32 %v472_v40, %v316_v36  ;;  %v445_v43 = vpop.f32.mrf.mxu0  ;;  %v455_v44 = vpop.f32.mrf.mxu1 }
 0x157   : > { %v482_v45 = vadd.f32 %v445_v43, %v305_v37  ;;  %v486_v46 = vadd.f32 %v455_v44, %v309_v38 }
 0x158   : > { %505 = vst [vmem:[%s1406_s22 + $0x48] sm:$0xff] %v489_v41 }
 0x159   : > { %509 = vst [vmem:[%s1406_s22 + $0x68] sm:$0xff] %v493_v42 }
 0x15a   : > { %498 = vst [vmem:[%s1406_s22 + $0x10] sm:$0xff] %v482_v45 }
 0x15b   : > { %502 = vst [vmem:[%s1406_s22 + $0x30] sm:$0xff] %v486_v46 }
 0x15d   : > { %v465_v51 = vpop.f32.mrf.mxu2  ;;  %v475_v52 = vpop.f32.mrf.mxu3 }
 0x15e   : > { %v490_v53 = vadd.f32 %v465_v51, %v313_v47  ;;  %v494_v54 = vadd.f32 %v475_v52, %v317_v48  ;;  %v447_v55 = vpop.f32.mrf.mxu0  ;;  %v457_v56 = vpop.f32.mrf.mxu1 }
 0x15f   : > { %v483_v57 = vadd.f32 %v447_v55, %v306_v49  ;;  %v487_v58 = vadd.f32 %v457_v56, %v310_v50 }
 0x160   : > { %506 = vst [vmem:[%s1406_s22 + $0x50] sm:$0xff] %v490_v53 }
 0x161   : > { %510 = vst [vmem:[%s1406_s22 + $0x70] sm:$0xff] %v494_v54 }
 0x162   : > { %499 = vst [vmem:[%s1406_s22 + $0x18] sm:$0xff] %v483_v57 }
 0x163   : > { %503 = vst [vmem:[%s1406_s22 + $0x38] sm:$0xff] %v487_v58 }
 0x165   : > { %v467_v61 = vpop.f32.mrf.mxu2  ;;  %v477_v62 = vpop.f32.mrf.mxu3 }
 0x166   : > { %v491_v63 = vadd.f32 %v467_v61, %v314_v59  ;;  %v495_v0 = vadd.f32 %v477_v62, %v318_v60 }
 0x168   : > { %507 = vst [vmem:[%s1406_s22 + $0x58] sm:$0xff] %v491_v63 }
 0x169   : > { %511 = vst [vmem:[%s1406_s22 + $0x78] sm:$0xff] %v495_v0 }
 0x16a PF: > { %s765_s10 = scalar_select %p1341_p5, [#allocation3], [#allocation17] }
 0x16b   : > { %s1594_s0 = smov (!%p1341_p5, %s1312_s0), 0  ;;  %s526_s9 = sshll.u32 %s1406_s22, 4  ;;  %s527_s9 = int_to_ptr.vmem [resolvable:$true] %s526_s9 }
 0x16c   : > { %s520_s29 = sld [smem:[%s765_s10 + %s1594_s0]]  ;;  %s513_s12 = scalar_lea.sflag [#allocation10], %s251_s8 }
 0x16d   : > { %s1019_s11 = scalar_lea.hbm %s1532_s7, 384 }
 0x172   : > { %s729_s28 = sshll.u32 %s520_s29, 7 }
 0x173   : > { %s525_s1 = scalar_lea.hbm %s1532_s7, %s729_s28 }
 0x174   : > { %s528_s13 = sshll.u32 %s525_s1, 4  ;;  %s529_s13 = int_to_ptr.hbm [resolvable:$true] %s528_s13 }
 0x175   : > { %s1013_s16 = sshra.s32 %s529_s13, 4  ;;  %s1014_s16 = int_to_ptr.hbm [resolvable:$true] %s1013_s16 }
 0x176   : > { %s1015_s21 = scalar_lea.hbm %s1014_s16, 128  ;;  %p1020_p0 = scmp.lt.s32.totalorder %s1014_s16, %s1532_s7 }
 0x177   : > { %p1016_p1 = scmp.ne.s32.totalorder %s1014_s16, %s1015_s21  ;;  %p1021_p3 = scmp.lt.s32.totalorder %s1019_s11, %s1015_s21 }
 0x179   : > { %p1017_p12 = pnand %p1016_p1, %p1341_p5  ;;  %p1022_p7 = por %p1021_p3, %p1020_p0 }
 0x17b   : > { %p1018_p6 = pneg %p1017_p12 }
 0x17d   : > { %p1023_p8 = pnand %p1022_p7, %p1018_p6 }
 0x17f   : > { %1026 = shalt.err (!%p1023_p8)
}
 0x180   : > { %s1130_s8 = smov 128   ;;  %s1131_s27 = smov 8  }
 0x181   : > { %767 = dma.vmem_to_hbm [thread:$0]  (%p1341_p5), %s527_s9, 2048, %s529_s13, %s513_s12, %s1130_s8, %s1130_s8, %s1131_s27  }
 0x182 PF: > { %p787_p11 = scmp.ge.s32.totalorder %s1119_s25, 2  ;;  %s543_s22 = sand.u32 1, %s1083_s2  }
 0x183   : > { %s544_s17 = scalar_lea.sflag [#allocation10], %s543_s22 }
 0x184   : > { %p783_p2 = pnand %p787_p11, %p1345_p4 }
 0x186   : > { %p784_p9 = pneg %p783_p2 }
 0x188   : > { %1078 = dma.done.wait (%p784_p9), %s544_s17, 2048  }
 0x189   : > { %1080 = vsyncadd (%p784_p9), %s544_s17, 4294965248  ;;  %s1570_s10 = sld [smem:[#allocation30_spill]]  ;;  %p51_p5 = scmp.ge.s32.totalorder %s1238_s26, 7  }
 0x18a   : > { %s1571_s29 = sld [smem:[#allocation25_spill]]  ;;  %s1575_s2 = smov %s1087_s3 }
 0x18b   : > { %s1572_s21 = sld [smem:[#allocation29_spill]]  ;;  %s1576_s3 = smov %s1091_s19 }
 0x18c   : > { %s1573_s9 = sld [smem:[#allocation26_spill]]  ;;  %s1578_s20 = smov %s1099_s4 }
 0x18d   : > { %s1574_s24 = sld [smem:[#allocation28_spill]]  ;;  %s1580_s22 = smov %s1111_s23 }
 0x18e   : > { %s1582_s25 = smov %s1238_s26  ;;  %53 = sbr.rel (!%p51_p5) target bundleno = 24 (0x18), region = 94 }
 0x18f   : > { %s1577_s19 = smov %s1570_s10 }
 0x190   : > { %s1579_s4 = smov %s1571_s29 }
 0x192   : > { %s1581_s23 = smov %s1573_s9 }
 0x193   :  { %550 = vsyncpa [#allocation9], 1 }
 0x194   :  { %552 = vsyncpa [#allocation9 + $0x1], 1 }
 0x195   :  { %553 = vsyncpa [#allocation12], 1 }
 0x196   :  { %555 = vsyncpa [#allocation12 + $0x1], 1 }
 0x197   :  { %556 = vsyncpa [#allocation10], 1 }
 0x198   :  { %558 = vsyncpa [#allocation10 + $0x1], 1 }

</bundles_post_ra>
